<compile_context>
chip_gen: v7x
topology: tpu7x:2x2x1
jax: 0.10.0
libtpu: 0.0.40
codegen_flags: <defaults>
</compile_context>

<pallas_src>
import jax
import jax.numpy as jnp
from jax.experimental import pallas as pl
from jax.experimental.pallas import tpu as pltpu


def _round_up(x, m):
    return ((x + m - 1) // m) * m


def _cdiv(a, b):
    return -(-a // b)


def _fit_tile(dim, target, align):
    """Pick (tile, padded_dim): tile is `align`-aligned and divides padded_dim.

    Unlike a naive round-to-target, the tile is sized so padded_dim exceeds dim
    by at most ~align per tile (no near-2x over-padding for dims just above a
    tile multiple, e.g. K=600 -> tile=384, Kp=768 instead of Kp=1024).
    """
    aligned = _round_up(dim, align)
    if aligned <= target:
        return aligned, aligned
    n_tiles = _cdiv(dim, target)
    tile = _round_up(_cdiv(dim, n_tiles), align)
    return tile, tile * n_tiles


def _gemm_kernel(x_ref, w_ref, o_ref, acc_ref):
    # x_ref: (tm, tk), w_ref: (tk, tn), o_ref: (tm, tn), acc_ref: (tm, tn) f32
    @pl.when(pl.program_id(3) == 0)
    def _init():
        acc_ref[...] = jnp.zeros_like(acc_ref)

    acc_ref[...] += jnp.dot(x_ref[...], w_ref[...],
                            preferred_element_type=jnp.float32)

    @pl.when(pl.program_id(3) == pl.num_programs(3) - 1)
    def _finalize():
        o_ref[...] = acc_ref[...].astype(o_ref.dtype)


def _gemm_bias_kernel(x_ref, w_ref, b_ref, o_ref, acc_ref):
    # b_ref: (1, tn) -- bias tile for this group's current N tile.
    @pl.when(pl.program_id(3) == 0)
    def _init():
        acc_ref[...] = jnp.zeros_like(acc_ref)

    acc_ref[...] += jnp.dot(x_ref[...], w_ref[...],
                            preferred_element_type=jnp.float32)

    @pl.when(pl.program_id(3) == pl.num_programs(3) - 1)
    def _finalize():
        # Bias added exactly once, in f32, only in the last-K finalize.
        acc = acc_ref[...] + b_ref[...].astype(jnp.float32)
        o_ref[...] = acc.astype(o_ref.dtype)


def grouped_linear(x, w_group, bias=None, *, tm=1024, tn=1024, tk=2048):
    """x: (G, M, K); w_group: (G, K, N); bias: (G, 1, N) or None."""
    G, M, K = x.shape
    Gw, Kw, N = w_group.shape
    assert Gw == G and Kw == K
    out_dtype = x.dtype

    x_itemsize = jnp.dtype(x.dtype).itemsize
    w_itemsize = jnp.dtype(w_group.dtype).itemsize
    o_itemsize = jnp.dtype(out_dtype).itemsize

    # dtype-dependent sublane alignment for M (8 for f32, 16 for bf16, 32 for 8-bit).
    m_align = 8 * max(1, 4 // x_itemsize)

    # Tile sizes + padded dims (sublane/lane aligned). K pads with zeros (exact);
    # M/N padding is only to keep tiles dividing the padded dims and stores
    # lane-dense, and is small with the improved _fit_tile.
    tm_, Mp = _fit_tile(M, tm, m_align)
    tn_, Np = _fit_tile(N, tn, 128)
    tk_, Kp = _fit_tile(K, tk, 128)

    # Make sure some "parallel" grid axis has >=2 blocks so the work can shard
    # across megacore / 2 TensorCores; halving tn keeps a 128-multiple and still
    # divides Np.
    if G * (Mp // tm_) * (Np // tn_) < 2 and tn_ % 256 == 0:
        tn_ //= 2

    if (Mp, Kp) != (M, K):
        x = jnp.pad(x, ((0, 0), (0, Mp - M), (0, Kp - K)))
    if (Kp, Np) != (K, N):
        w_group = jnp.pad(w_group, ((0, 0), (0, Kp - K), (0, Np - N)))
    if bias is not None and Np != N:
        bias = jnp.pad(bias, ((0, 0), (0, 0), (0, Np - N)))

    grid = (G, Mp // tm_, Np // tn_, Kp // tk_)

    # Group dim squeezed (None) -> kernel refs are 2-D tiles.
    x_spec = pl.BlockSpec((None, tm_, tk_), lambda g, i, j, k: (g, i, k))
    w_spec = pl.BlockSpec((None, tk_, tn_), lambda g, i, j, k: (g, k, j))
    o_spec = pl.BlockSpec((None, tm_, tn_), lambda g, i, j, k: (g, i, j))

    # Truthful traffic estimate: x re-streamed per N tile, w re-streamed per M tile.
    bytes_accessed = (x_itemsize * G * Mp * Kp * (Np // tn_)
                      + w_itemsize * G * Kp * Np * (Mp // tm_)
                      + o_itemsize * G * Mp * Np)
    if bias is not None:
        bytes_accessed += jnp.dtype(bias.dtype).itemsize * G * Np * (Mp // tm_)
    cost = pl.CostEstimate(
        flops=2 * G * Mp * Kp * Np,
        transcendentals=0,
        bytes_accessed=int(bytes_accessed),
    )

    if bias is None:
        kernel = _gemm_kernel
        in_specs = [x_spec, w_spec]
        args = (x, w_group)
        bias_tile_bytes = 0
    else:
        kernel = _gemm_bias_kernel
        b_spec = pl.BlockSpec((None, 1, tn_), lambda g, i, j, k: (g, 0, j))
        in_specs = [x_spec, w_spec, b_spec]
        args = (x, w_group, bias)
        bias_tile_bytes = tn_ * jnp.dtype(bias.dtype).itemsize

    # Explicit VMEM budget: double-buffered inputs/outputs + f32 accumulator,
    # plus headroom.  ~24 MiB at the default 1024/1024/2048 bf16 tiles, which
    # fits the v7x 64 MiB per-TC VMEM and exceeds the low v5e scoped default.
    in_tile_bytes = tm_ * tk_ * x_itemsize + tk_ * tn_ * w_itemsize + bias_tile_bytes
    out_tile_bytes = tm_ * tn_ * o_itemsize
    acc_bytes = tm_ * tn_ * 4
    needed = 2 * in_tile_bytes + 2 * out_tile_bytes + acc_bytes
    vmem_limit = max(needed + (4 << 20), 32 << 20)

    out = pl.pallas_call(
        kernel,
        out_shape=jax.ShapeDtypeStruct((G, Mp, Np), out_dtype),
        grid_spec=pltpu.PrefetchScalarGridSpec(
            num_scalar_prefetch=0,
            grid=grid,
            in_specs=in_specs,
            out_specs=o_spec,
            scratch_shapes=[pltpu.VMEM((tm_, tn_), jnp.float32)],
        ),
        compiler_params=pltpu.CompilerParams(
            dimension_semantics=("parallel", "parallel", "parallel", "arbitrary"),
            vmem_limit_bytes=int(vmem_limit)),
        cost_estimate=cost,
    )(*args)

    if (Mp, Np) != (M, N):
        out = out[:, :M, :N]
    return out


class GroupedLinearPallas:
    """JAX/Pallas port of GroupedLinear (forward only)."""

    def __init__(self, n_layers, in_features, out_features,
                 dtype=jnp.bfloat16, bias=False, key=None):
        key = jax.random.PRNGKey(0) if key is None else key
        wk = jax.random.split(key, n_layers)
        # nn.Parameter(torch.randn(in_features, out_features)) per layer.
        self.wg = jnp.stack([
            jax.random.normal(wk[i], (in_features, out_features), dtype=jnp.float32)
            for i in range(n_layers)
        ]).astype(dtype)                                   # (G, K, N)
        self.bias = (jnp.zeros((n_layers, 1, out_features), dtype=dtype)
                     if bias else None)

    def __call__(self, x):
        return grouped_linear(x, self.wg, self.bias)


if __name__ == "__main__":
    key = jax.random.PRNGKey(0)
    G, M, K, N = 3, 8, 32, 64   # n_layers=3, batch rows=8, in=32, out=64

    kx, kp, kb, kr = jax.random.split(key, 4)
    x = jax.random.normal(kx, (G, M, K), dtype=jnp.float32).astype(jnp.bfloat16)

    # --- no-bias path --------------------------------------------------------
    module = GroupedLinearPallas(G, K, N, dtype=jnp.bfloat16, bias=False, key=kp)
    out = jax.block_until_ready(module(x))

    ref = jnp.einsum("gmk,gkn->gmn",
                     x.astype(jnp.float32),
                     module.wg.astype(jnp.float32)).astype(jnp.bfloat16)
    assert out.shape == (G, M, N) and out.dtype == jnp.bfloat16
    err = jnp.max(jnp.abs(out.astype(jnp.float32) - ref.astype(jnp.float32)))
    assert jnp.allclose(out.astype(jnp.float32), ref.astype(jnp.float32),
                        atol=5e-2, rtol=5e-2), f"no-bias max abs err = {err}"

    # --- bias path -----------------------------------------------------------
    module_b = GroupedLinearPallas(G, K, N, dtype=jnp.bfloat16, bias=True, key=kp)
    module_b.bias = jax.random.normal(
        kb, (G, 1, N), dtype=jnp.float32).astype(jnp.bfloat16)
    out_b = jax.block_until_ready(module_b(x))

    ref_b = (jnp.einsum("gmk,gkn->gmn",
                        x.astype(jnp.float32),
                        module_b.wg.astype(jnp.float32))
             + module_b.bias.astype(jnp.float32)).astype(jnp.bfloat16)
    assert out_b.shape == (G, M, N) and out_b.dtype == jnp.bfloat16
    err_b = jnp.max(jnp.abs(out_b.astype(jnp.float32) - ref_b.astype(jnp.float32)))
    assert jnp.allclose(out_b.astype(jnp.float32), ref_b.astype(jnp.float32),
                        atol=5e-2, rtol=5e-2), f"bias max abs err = {err_b}"

    # --- ragged (unaligned) shapes exercise the improved _fit_tile padding ----
    Gr, Mr, Kr, Nr = 2, 20, 100, 200
    xr = jax.random.normal(kr, (Gr, Mr, Kr), dtype=jnp.float32).astype(jnp.bfloat16)
    module_r = GroupedLinearPallas(Gr, Kr, Nr, dtype=jnp.bfloat16, bias=False, key=kp)
    out_r = jax.block_until_ready(module_r(xr))
    ref_r = jnp.einsum("gmk,gkn->gmn",
                       xr.astype(jnp.float32),
                       module_r.wg.astype(jnp.float32)).astype(jnp.bfloat16)
    assert out_r.shape == (Gr, Mr, Nr) and out_r.dtype == jnp.bfloat16
    err_r = jnp.max(jnp.abs(out_r.astype(jnp.float32) - ref_r.astype(jnp.float32)))
    assert jnp.allclose(out_r.astype(jnp.float32), ref_r.astype(jnp.float32),
                        atol=2e-1, rtol=5e-2), f"ragged max abs err = {err_r}"

    print("KERNEL_OK")
</pallas_src>

<mosaic_0001>
module attributes {stable_mosaic.version = 11 : i64} {
  func.func @_gemm_kernel(%arg0: i32, %arg1: i32, %arg2: i32, %arg3: i32, %arg4: memref<1x16x128xbf16, #tpu.memory_space<vmem>>, %arg5: memref<1x128x128xbf16, #tpu.memory_space<vmem>>, %arg6: memref<1x16x128xbf16, #tpu.memory_space<vmem>>, %arg7: memref<16x128xf32, #tpu.memory_space<vmem>>) attributes {dimension_semantics = [#tpu.dimension_semantics<parallel>, #tpu.dimension_semantics<parallel>, #tpu.dimension_semantics<parallel>, #tpu.dimension_semantics<arbitrary>], iteration_bounds = array<i64: 3, 1, 1, 1>, scalar_prefetch = 0 : i64, scratch_operands = 1 : i64, tpu.core_type = #tpu.core_type<tc>, window_params = [{transform_indices = @transform_0, window_bounds = array<i64: 1, 16, 128>}, {transform_indices = @transform_1, window_bounds = array<i64: 1, 128, 128>}, {transform_indices = @transform_2, window_bounds = array<i64: 1, 16, 128>}]} {
    %c0_i32 = arith.constant 0 : i32
    %0 = arith.cmpi eq, %arg3, %c0_i32 : i32
    %1 = arith.extui %0 : i1 to i32
    %c0_i32_0 = arith.constant 0 : i32
    %2 = arith.cmpi ne, %1, %c0_i32_0 : i32
    scf.if %2 {
      %cst_12 = arith.constant 0.000000e+00 : f32
      %14 = vector.broadcast %cst_12 : f32 to vector<16x128xf32>
      %c0_13 = arith.constant 0 : index
      %c0_14 = arith.constant 0 : index
      %15 = vector.load %arg7[%c0_13, %c0_14] : memref<16x128xf32, #tpu.memory_space<vmem>>, vector<16x128xf32>
      tpu.vector_store %arg7[%c0_13, %c0_14], %14 {strides = array<i32>} : memref<16x128xf32, #tpu.memory_space<vmem>>, vector<16x128xf32>,
    } else {
    }
    %c0 = arith.constant 0 : index
    %c0_1 = arith.constant 0 : index
    %3 = vector.load %arg7[%c0, %c0_1] : memref<16x128xf32, #tpu.memory_space<vmem>>, vector<16x128xf32>
    %c0_2 = arith.constant 0 : index
    %c0_3 = arith.constant 0 : index
    %c0_4 = arith.constant 0 : index
    %4 = vector.load %arg4[%c0_2, %c0_3, %c0_4] : memref<1x16x128xbf16, #tpu.memory_space<vmem>>, vector<1x16x128xbf16>
    %5 = vector.shape_cast %4 : vector<1x16x128xbf16> to vector<16x128xbf16>
    %c0_5 = arith.constant 0 : index
    %c0_6 = arith.constant 0 : index
    %c0_7 = arith.constant 0 : index
    %6 = vector.load %arg5[%c0_5, %c0_6, %c0_7] : memref<1x128x128xbf16, #tpu.memory_space<vmem>>, vector<1x128x128xbf16>
    %7 = vector.shape_cast %6 : vector<1x128x128xbf16> to vector<128x128xbf16>
    %cst = arith.constant dense<0.000000e+00> : vector<16x128xf32>
    %8 = tpu.matmul %5, %7, %cst {dimension_numbers = #tpu.dot_dimension_numbers<[1], [0], [0], [1], [0, 0, 1, 1], [], []>} : vector<16x128xbf16>, vector<128x128xbf16>, vector<16x128xf32> -> vector<16x128xf32>
    %9 = arith.addf %3, %8 : vector<16x128xf32>
    %c0_8 = arith.constant 0 : index
    %c0_9 = arith.constant 0 : index
    %10 = vector.load %arg7[%c0_8, %c0_9] : memref<16x128xf32, #tpu.memory_space<vmem>>, vector<16x128xf32>
    tpu.vector_store %arg7[%c0_8, %c0_9], %9 {strides = array<i32>} : memref<16x128xf32, #tpu.memory_space<vmem>>, vector<16x128xf32>,
    %c0_i32_10 = arith.constant 0 : i32
    %11 = arith.cmpi eq, %arg3, %c0_i32_10 : i32
    %12 = arith.extui %11 : i1 to i32
    %c0_i32_11 = arith.constant 0 : i32
    %13 = arith.cmpi ne, %12, %c0_i32_11 : i32
    scf.if %13 {
      %c0_12 = arith.constant 0 : index
      %c0_13 = arith.constant 0 : index
      %14 = vector.load %arg7[%c0_12, %c0_13] : memref<16x128xf32, #tpu.memory_space<vmem>>, vector<16x128xf32>
      %15 = arith.truncf %14 : vector<16x128xf32> to vector<16x128xbf16>
      %c0_14 = arith.constant 0 : index
      %c0_15 = arith.constant 0 : index
      %c0_16 = arith.constant 0 : index
      %16 = vector.load %arg6[%c0_14, %c0_15, %c0_16] : memref<1x16x128xbf16, #tpu.memory_space<vmem>>, vector<1x16x128xbf16>
      %17 = vector.shape_cast %16 : vector<1x16x128xbf16> to vector<16x128xbf16>
      %18 = vector.shape_cast %15 : vector<16x128xbf16> to vector<1x16x128xbf16>
      tpu.vector_store %arg6[%c0_14, %c0_15, %c0_16], %18 {strides = array<i32>} : memref<1x16x128xbf16, #tpu.memory_space<vmem>>, vector<1x16x128xbf16>,
    } else {
    }
    return
  }
  func.func @transform_0(%arg0: i32, %arg1: i32, %arg2: i32, %arg3: i32) -> (i32, i32, i32) {
    %c0_i32 = arith.constant 0 : i32
    return %arg0, %arg1, %arg3 : i32, i32, i32
  }
  func.func @transform_1(%arg0: i32, %arg1: i32, %arg2: i32, %arg3: i32) -> (i32, i32, i32) {
    %c0_i32 = arith.constant 0 : i32
    return %arg0, %arg3, %arg2 : i32, i32, i32
  }
  func.func @transform_2(%arg0: i32, %arg1: i32, %arg2: i32, %arg3: i32) -> (i32, i32, i32) {
    %c0_i32 = arith.constant 0 : i32
    return %arg0, %arg1, %arg2 : i32, i32, i32
  }
}

</mosaic_0001>

<bundles_post_ra>
// kernel: tpu_custom_call.1
= control target key start
LH: loop header
LB: loop body
LE: loop exit
PB: predicated region body
PF: predicated region fallthrough
CT: control target
= control target key end

     0   :  { %7 = vsyncpa [#allocation4], 0  ;;  %s1088_s0 = inlined_call_operand.hbm [shape: bf16[3,16,128], index: 0, kind: input, shape index: {}]   ;;  %s1089_s1 = inlined_call_operand.hbm [shape: bf16[3,128,128], index: 1, kind: input, shape index: {}]   ;;  %s1090_s2 = inlined_call_operand.hbm [shape: bf16[3,16,128], index: 2, kind: output, shape index: {}]  }
   0x1   :  { %9 = vsyncpa [#allocation4 + $0x1], 0 }
   0x2   :  { %10 = vsyncpa [#allocation7], 0 }
   0x3   :  { %12 = vsyncpa [#allocation7 + $0x1], 0 }
   0x4   :  { %13 = vsyncpa [#allocation5], 0 }
   0x5   :  { %15 = vsyncpa [#allocation5 + $0x1], 0  ;;  %s852_s9 = smov 0   ;;  %s854_s10 = smov 0  }
   0x6   :  { %s856_s11 = smov 0   ;;  %s858_s12 = smov 0  }
   0x7   :  { %s860_s13 = smov 0   ;;  %s862_s14 = smov 0  }
   0x8 LB: > { %s529_s15 = sadd.s32 4294967295, %s826_s14   ;;  %s530_s16 = sadd.s32 4294967294, %s826_s14   ;;  %s826_s14 = sphi %s862_s14, %s21_s14   ;;  %s822_s13 = sphi %s860_s13, %s1107_s13   ;;  %s818_s12 = sphi %s858_s12, %s1106_s12   ;;  %s814_s11 = sphi %s856_s11, %s1105_s11   ;;  %s810_s10 = sphi %s854_s10, %s1104_s10   ;;  %s806_s9 = sphi %s852_s9, %s1103_s9  }
   0x9   : > { %s47_s17 = sadd.s32 1, %s822_s13  ;;  %s58_s18 = sadd.s32 1, %s814_s11 }
   0xa   : > { %p49_p0 = scmp.ge.s32.totalorder %s47_s17, 3  ;;  %p65_p1 = scmp.ne.s32.totalorder %s814_s11, %s810_s10 }
   0xb   : > { %p66_p2 = scmp.eq.s32.totalorder %s826_s14, 0  ;;  %p71_p3 = scmp.ne.s32.totalorder %s810_s10, %s806_s9 }
   0xc   : > { %s1109_s17 = smov (%p49_p0, %s47_s17), 0  ;;  %p72_p5 = scmp.eq.s32.totalorder %s529_s15, 0 }
   0xd   : > { %p893_p4 = por %p66_p2, %p65_p1  ;;  %s51_s20 = ssub.s32 %s822_s13, %s1109_s17 }
   0xe   : > { %p129_p6 = scmp.eq.s32.totalorder %s529_s15, 2  ;;  %p56_p7 = scmp.eq.s32.totalorder %s51_s20, 0 }
   0xf   : > { %p899_p8 = por %p72_p5, %p71_p3  ;;  %p135_p10 = scmp.eq.s32.totalorder %s530_s16, 2 }
  0x10   : > { %p903_p9 = por %p129_p6, %p65_p1  ;;  %p615_p12 = scmp.lt.s32.totalorder %s826_s14, 3 }
  0x11   : > { %s1094_s21 = scalar_select %p899_p8, 1, 0 }
  0x12   : > { %s1095_s22 = scalar_select %p903_p9, 1, 0 }
  0x13   : > { %s908_s23 = scalar_select %p56_p7, %s814_s11, %s58_s18  }
  0x14   : > { %p910_p11 = por %p135_p10, %p71_p3  ;;  %s916_s25 = sand.u32 1, %s814_s11  }
  0x15   : > { %s533_s26 = sshll.u32 %s916_s25, 3  ;;  %s559_s27 = sshll.u32 %s822_s13, 7 }
  0x16   : > { %s1096_s24 = scalar_select %p910_p11, 1, 0 }
  0x17   : > { %s923_s30 = scalar_lea.hbm %s1088_s0, %s559_s27  ;;  %s159_s3 = scalar_lea.vmem [#allocation3], %s533_s26 }
  0x18   : > { %s169_s4 = sshll.u32 %s159_s3, 4  ;;  %p929_p13 = pnand %p615_p12, %p893_p4  ;;  %s925_s4 = int_to_ptr.vmem [resolvable:$true] %s169_s4 }
  0x19   : > { %s156_s6 = scalar_lea.sflag [#allocation4], %s916_s25  ;;  %s680_s7 = scalar_lea.hbm %s923_s30, 128 }
  0x1a   : > { %p681_p1 = scmp.ne.s32.totalorder %s923_s30, %s680_s7  ;;  %p682_p2 = pneg %p929_p13 }
  0x1b   : > { %s685_s16 = scalar_lea.hbm %s1088_s0, 384  ;;  %p686_p4 = scmp.lt.u32.totalorder %s923_s30, %s1088_s0 }
  0x1c   : > { %p683_p3 = pnand %p682_p2, %p681_p1  ;;  %p687_p6 = scmp.lt.u32.totalorder %s685_s16, %s680_s7 }
  0x1d   : > { %p689_p10 = scmp.lt.u32.totalorder %s680_s7, %s923_s30 }
  0x1e   : > { %p684_p5 = pneg %p683_p3  ;;  %p688_p7 = por %p687_p6, %p686_p4 }
  0x20   : > { %p690_p12 = por %p689_p10, %p688_p7 }
  0x22   : > { %p691_p0 = pnand %p690_p12, %p684_p5 }
  0x24   : > { %694 = shalt.err (!%p691_p0)
}
  0x25   : > { %s695_s20 = scalar_lea.vmem %s925_s4, 128  ;;  %s828_s26 = smov [#allocation3]  }
  0x26   : > { %p696_p1 = scmp.ne.s32.totalorder %s925_s4, %s695_s20  ;;  %s700_s27 = sshll.u32 %s828_s26, 4  ;;  %s701_s27 = int_to_ptr.vmem [resolvable:$false] %s700_s27 }
  0x27   : > { %s702_s28 = scalar_lea.vmem %s701_s27, 256  ;;  %p703_p9 = scmp.lt.s32.totalorder %s925_s4, %s701_s27 }
  0x28   : > { %p698_p3 = pnand %p696_p1, %p682_p2  ;;  %p704_p4 = scmp.lt.s32.totalorder %s702_s28, %s695_s20 }
  0x2a   : > { %p699_p11 = pneg %p698_p3  ;;  %p705_p6 = por %p704_p4, %p703_p9 }
  0x2c   : > { %p706_p7 = pnand %p705_p6, %p699_p11 }
  0x2e   : > { %709 = shalt.err (!%p706_p7)
}
  0x2f   : > { %s829_s29 = smov 64   ;;  %s830_s3 = smov 4  }
  0x30   : > { %607 = dma.hbm_to_vmem [thread:$0]  (!%p929_p13), %s923_s30, 128, %s925_s4, %s156_s6, %s829_s29, %s829_s29, %s830_s3  }
  0x31   : > { %p201_p9 = scmp.lt.s32.totalorder %s826_s14, 4  ;;  %s536_s7 = sshll.u32 %s916_s25, 6 }
  0x32   : > { %s560_s8 = sshll.u32 %s822_s13, 10  ;;  %p1098_p11 = scmp.ge.s32.totalorder %s826_s14, 1 }
  0x33   : > { %s977_s19 = scalar_lea.hbm %s1089_s1, %s560_s8  ;;  %s183_s20 = scalar_lea.vmem [#allocation6], %s536_s7 }
  0x34   : > { %p970_p0 = pnand %p1098_p11, %p201_p9  ;;  %s193_s26 = sshll.u32 %s183_s20, 4  ;;  %s979_s26 = int_to_ptr.vmem [resolvable:$true] %s193_s26 }
  0x35   : > { %s180_s30 = scalar_lea.sflag [#allocation7], %s916_s25  ;;  %s710_s4 = scalar_lea.hbm %s977_s19, 1024 }
  0x36   : > { %p711_p5 = scmp.ne.s32.totalorder %s977_s19, %s710_s4  ;;  %s715_s28 = scalar_lea.hbm %s1089_s1, 3072 }
  0x37   : > { %p716_p1 = scmp.lt.u32.totalorder %s977_s19, %s1089_s1  ;;  %p717_p3 = scmp.lt.u32.totalorder %s715_s28, %s710_s4 }
  0x38   : > { %p713_p10 = pnand %p711_p5, %p682_p2  ;;  %p719_p6 = scmp.lt.u32.totalorder %s710_s4, %s977_s19 }
  0x39   : > { %p718_p4 = por %p717_p3, %p716_p1 }
  0x3a   : > { %p714_p12 = pneg %p713_p10 }
  0x3b   : > { %p720_p7 = por %p719_p6, %p718_p4 }
  0x3d   : > { %p721_p9 = pnand %p720_p7, %p714_p12 }
  0x3f   : > { %724 = shalt.err (!%p721_p9)
}
  0x40   : > { %s725_s7 = scalar_lea.vmem %s979_s26, 1024  ;;  %s831_s18 = smov [#allocation6]  }
  0x41   : > { %p726_p11 = scmp.ne.s32.totalorder %s979_s26, %s725_s7  ;;  %s730_s20 = sshll.u32 %s831_s18, 4  ;;  %s731_s20 = int_to_ptr.vmem [resolvable:$false] %s730_s20 }
  0x42   : > { %s732_s6 = scalar_lea.vmem %s731_s20, 2048  ;;  %p733_p8 = scmp.lt.s32.totalorder %s979_s26, %s731_s20 }
  0x43   : > { %p728_p5 = pnand %p726_p11, %p682_p2  ;;  %p734_p1 = scmp.lt.s32.totalorder %s732_s6, %s725_s7 }
  0x45   : > { %p729_p10 = pneg %p728_p5  ;;  %p735_p3 = por %p734_p1, %p733_p8 }
  0x47   : > { %p736_p4 = pnand %p735_p3, %p729_p10 }
  0x49   : > { %739 = shalt.err (!%p736_p4)
}
  0x4a   : > { %610 = dma.hbm_to_vmem [thread:$0]  (!%p929_p13), %s977_s19, 1024, %s979_s26, %s180_s30, %s829_s29, %s829_s29, %s830_s3  }
  0x4b   : > { %205 = sbr.rel (%p970_p0) target bundleno = 350 (0x15e), region = 28  ;;  %s1013_s4 = sand.u32 (!%p970_p0), 1, %s810_s10  }
  0x4c   : > { %s540_s27 = sshll.u32 (!%p970_p0), %s1013_s4, 3  ;;  %s208_s5 = scalar_lea.sflag (!%p970_p0), [#allocation4], %s1013_s4 }
  0x4d   : > { %s1019_s28 = scalar_lea.vmem (!%p970_p0), [#allocation3], %s540_s27  ;;  %p1100_p8 = scmp.ne.s32.totalorder (!%p970_p0), %s1094_s21, 0 }
  0x52   : > { %793 = dma.done.wait (%p1100_p8), %s208_s5, 128  }
  0x53   : > { %795 = vsyncadd (%p1100_p8), %s208_s5, 4294967168  ;;  %s541_s25 = sshll.u32 %s1013_s4, 6  ;;  %s217_s29 = scalar_lea.sflag [#allocation7], %s1013_s4 }
  0x54   : > { %s220_s3 = scalar_lea.vmem [#allocation6], %s541_s25 }
  0x55   : > { %797 = dma.done.wait (%p1100_p8), %s217_s29, 1024  }
  0x56   : > { %799 = vsyncadd (%p1100_p8), %s217_s29, 4294966272  ;;  %v832_v0 = vmov 0.0   ;;  %vm833_vm0 = vmmov 0   ;;  %v671_v1 = vld [vmem:[%s220_s3] sm:$0xff]   ;;  %v672_v2 = vld [vmem:[%s220_s3 + $0x8] sm:$0xff]   ;;  %s245_s21 = scalar_lea.vmem [#allocation8], %s540_s27 }
  0x57   : > { %578 = vmatprep.subr.bf16.mxu0 %v832_v0  ;;  %594 = vmatprep.mubr.msk.bf16.mxu0 %vm833_vm0, %v832_v0  ;;  %v673_v3 = vld [vmem:[%s220_s3 + $0x10] sm:$0xff]   ;;  %v674_v4 = vld [vmem:[%s220_s3 + $0x18] sm:$0xff]   ;;  %v675_v5 = vld [vmem:[%s220_s3 + $0x20] sm:$0xff]   ;;  %s407_s15 = sshll.u32 %s245_s21, 4  ;;  %s563_s19 = sshll.u32 %s818_s12, 7  ;;  %s1035_s15 = int_to_ptr.vmem [resolvable:$true] %s407_s15 }
  0x58   : > { %579 = vmatpush3.bf16.msra.mxu0 %v671_v1  ;;  %v676_v6 = vld [vmem:[%s220_s3 + $0x28] sm:$0xff]   ;;  %v677_v7 = vld [vmem:[%s220_s3 + $0x30] sm:$0xff]   ;;  %v678_v8 = vld [vmem:[%s220_s3 + $0x38] sm:$0xff]   ;;  %s1040_s8 = scalar_lea.hbm %s1090_s2, %s563_s19  ;;  %s391_s16 = scalar_lea.sflag [#allocation5], %s1013_s4 }
  0x59   : > { %580 = vmatprep.subr.bf16.mxu0 %v832_v0  ;;  %v679_v9 = vld [vmem:[%s1019_s28] sm:$0xff]   ;;  %s740_s7 = scalar_lea.vmem %s1035_s15, 128  ;;  %p1101_p2 = scmp.ne.s32.totalorder %s1095_s22, 0 }
  0x5a   : > { %p741_p13 = scmp.ne.s32.totalorder %s1035_s15, %s740_s7  ;;  %s834_s12 = smov [#allocation8]  }
  0x5b   : > { %s744_s18 = sshll.u32 %s834_s12, 4  ;;  %s745_s18 = int_to_ptr.vmem [resolvable:$false] %s744_s18 }
  0x5c   : > { %581 = vmatpush3.bf16.msra.mxu0 %v672_v2  ;;  %p742_p0 = pnand %p741_p13, %p1101_p2  ;;  %s746_s20 = scalar_lea.vmem %s745_s18, 256 }
  0x5d   : > { %582 = vmatprep.subr.bf16.mxu0 %v832_v0  ;;  %p747_p6 = scmp.lt.s32.totalorder %s1035_s15, %s745_s18  ;;  %p748_p7 = scmp.lt.s32.totalorder %s746_s20, %s740_s7 }
  0x5e   : > { %p743_p12 = pneg %p742_p0 }
  0x5f   : > { %p749_p9 = por %p748_p7, %p747_p6 }
  0x60   : > { %583 = vmatpush3.bf16.msra.mxu0 %v673_v3 }
  0x61   : > { %584 = vmatprep.subr.bf16.mxu0 %v832_v0  ;;  %p750_p11 = pnand %p749_p9, %p743_p12 }
  0x64   : > { %585 = vmatpush3.bf16.msra.mxu0 %v674_v4 }
  0x65   : > { %586 = vmatprep.subr.bf16.mxu0 %v832_v0 }
  0x68   : > { %587 = vmatpush3.bf16.msra.mxu0 %v675_v5 }
  0x69   : > { %588 = vmatprep.subr.bf16.mxu0 %v832_v0 }
  0x6c   : > { %589 = vmatpush3.bf16.msra.mxu0 %v676_v6 }
  0x6d   : > { %590 = vmatprep.subr.bf16.mxu0 %v832_v0 }
  0x70   : > { %591 = vmatpush3.bf16.msra.mxu0 %v677_v7 }
  0x71   : > { %592 = vmatprep.subr.bf16.mxu0 %v832_v0 }
  0x74   : > { %593 = vmatpush3.bf16.msra.mxu0 %v678_v8 }
  0x77   : > { %595 = vmatmul.mubr.bf16.vlgmr.msra.gmra.mrb[0].mxu0 %v679_v9 }
 0x14a   : > { %v364_v10 = vpop.f32.mrb[0].mxu0 }
 0x14b   : > { %v596_v11 = vpop.f32.mrb[1].mxu0 }
 0x14c   : > { %v367_v12 = vpop.f32.mrb[2].mxu0 }
 0x14d   : > { %v567_v13 = vpack.c.bf16 %v367_v12, %v364_v10  ;;  %v597_v14 = vpop.f32.mrb[3].mxu0 }
 0x14f   : > { %568 = vst [vmem:[%s245_s21] sm:$0xff] %v567_v13  }
 0x150   : > { %753 = shalt.err (!%p750_p11)
}
 0x151   : > { %s754_s6 = scalar_lea.hbm %s1040_s8, 128  ;;  %s758_s28 = scalar_lea.hbm %s1090_s2, 384 }
 0x152   : > { %p755_p5 = scmp.ne.s32.totalorder %s1040_s8, %s754_s6  ;;  %p759_p3 = scmp.lt.u32.totalorder %s1040_s8, %s1090_s2 }
 0x153   : > { %p760_p4 = scmp.lt.u32.totalorder %s758_s28, %s754_s6  ;;  %p762_p13 = scmp.lt.u32.totalorder %s754_s6, %s1040_s8 }
 0x154   : > { %p756_p10 = pnand %p755_p5, %p1101_p2 }
 0x155   : > { %p761_p8 = por %p760_p4, %p759_p3 }
 0x156   : > { %p757_p1 = pneg %p756_p10 }
 0x157   : > { %p763_p0 = por %p762_p13, %p761_p8 }
 0x159   : > { %p764_p12 = pnand %p763_p0, %p757_p1 }
 0x15b   : > { %767 = shalt.err (!%p764_p12)
}
 0x15c   : > { %s835_s3 = smov 64   ;;  %s836_s21 = smov 4  }
 0x15d   : > { %602 = dma.vmem_to_hbm [thread:$0]  (%p1101_p2), %s1035_s15, 128, %s1040_s8, %s391_s16, %s835_s3, %s835_s3, %s836_s21  }
 0x15e PF: > { %p616_p6 = scmp.ge.s32.totalorder %s826_s14, 2  ;;  %s422_s19 = sand.u32 1, %s806_s9  }
 0x15f   : > { %p1102_p7 = scmp.ne.s32.totalorder %s1096_s24, 0  ;;  %s423_s26 = scalar_lea.sflag [#allocation5], %s422_s19 }
 0x161   : > { %p612_p9 = pnand %p616_p6, %p1102_p7 }
 0x163   : > { %801 = dma.done.wait (!%p612_p9), %s423_s26, 128  }
 0x164   : > { %803 = vsyncadd (!%p612_p9), %s423_s26, 4294967168  ;;  %s21_s14 = sadd.s32 1, %s826_s14   ;;  %s1103_s9 = smov %s810_s10 }
 0x165   : > { %p18_p11 = scmp.ge.s32.totalorder %s21_s14, 5   ;;  %s1104_s10 = smov %s814_s11 }
 0x166   : > { %s1105_s11 = smov %s908_s23  ;;  %s1106_s12 = smov %s822_s13 }
 0x167   : > { %s1107_s13 = smov %s1109_s17  ;;  %20 = sbr.rel (!%p18_p11) target bundleno = 8 (0x8), region = 94 }
 0x16e   :  { %428 = vsyncpa [#allocation4], 1 }
 0x16f   :  { %430 = vsyncpa [#allocation4 + $0x1], 1 }
 0x170   :  { %431 = vsyncpa [#allocation7], 1 }
 0x171   :  { %433 = vsyncpa [#allocation7 + $0x1], 1 }
 0x172   :  { %434 = vsyncpa [#allocation5], 1 }
 0x173   :  { %436 = vsyncpa [#allocation5 + $0x1], 1 }

</bundles_post_ra>
